<compile_context>
chip_gen: v5e
topology: v5e:2x2
jax: 0.10.0
libtpu: 0.0.40
codegen_flags: <defaults>
</compile_context>

<pallas_src>
import functools

import jax
import jax.numpy as jnp
from jax.experimental import pallas as pl
from jax.experimental.pallas import tpu as pltpu

_MASK_VALUE = -1e30  # large finite negative: NaN-safe even for fully-masked rows


def mha_kernel(x_ref, wq_ref, wk_ref, wv_ref, wp_ref, bp_ref, o_ref,
               *, n_head, matmul_dtype):
    f32 = jnp.float32
    block_b, T, C = x_ref.shape
    H = n_head

    # Per-head weights, already (H, C, D) / (H, D, C) from the host; constant
    # index_map keeps them resident in VMEM across all grid steps.
    wq = wq_ref[...].astype(matmul_dtype)          # (H, C, D)  (1/sqrt(D) pre-folded)
    wk = wk_ref[...].astype(matmul_dtype)          # (H, C, D)
    wv = wv_ref[...].astype(matmul_dtype)          # (H, C, D)
    wp = wp_ref[...].astype(matmul_dtype)          # (H, D, C)
    bias = bp_ref[...].astype(f32)                 # (1, C)

    # Causal mask, built once per kernel invocation.
    row = jax.lax.broadcasted_iota(jnp.int32, (T, T), 0)
    col = jax.lax.broadcasted_iota(jnp.int32, (T, T), 1)
    causal = (row >= col)[None]                    # (1, T, T) -> broadcast over heads

    # Unrolled loop over the batch elements of this block (amortizes per-grid-step
    # overhead).  Every stage is a single leading-batch (H, ., .) MXU contraction:
    # no per-head lane slicing, no stack/concat, no head-axis transposes.
    for b in range(block_b):
        xb = x_ref[b].astype(matmul_dtype)                         # (T, C)
        xh = jnp.broadcast_to(xb[None], (H, T, C))                 # (H, T, C)

        q = jnp.einsum('htc,hcd->htd', xh, wq, preferred_element_type=f32)  # (H,T,D)
        k = jnp.einsum('htc,hcd->htd', xh, wk, preferred_element_type=f32)
        v = jnp.einsum('htc,hcd->htd', xh, wv, preferred_element_type=f32)

        s = jnp.einsum('hqd,hkd->hqk', q.astype(matmul_dtype), k.astype(matmul_dtype),
                       preferred_element_type=f32)                 # (H, T, T)
        s = jnp.where(causal, s, _MASK_VALUE)

        # f32 softmax stats on every generation (v5e VPU/EUP have no bf16).
        m = jnp.max(s, axis=-1, keepdims=True)
        p = jnp.exp(s - m)
        p = p / jnp.sum(p, axis=-1, keepdims=True)                 # exact normalization

        attn = jnp.einsum('hqk,hkd->hqd', p.astype(matmul_dtype), v.astype(matmul_dtype),
                          preferred_element_type=f32)              # (H, T, D)

        # Head merge + output projection: batched per-head partial projections,
        # reduced over the head axis (replaces concat(heads) @ wp).
        partial = jnp.einsum('htd,hdc->htc', attn.astype(matmul_dtype), wp,
                             preferred_element_type=f32)           # (H, T, C)
        out = jnp.sum(partial, axis=0) + bias                      # (T, C)
        o_ref[b] = out.astype(o_ref.dtype)


def _auto_block_b(batch):
    # Largest block of batch elements that still leaves >= 2 grid steps (so both
    # v7x TensorCores get work), capped at 8.
    for bb in (8, 4, 2):
        if batch % bb == 0 and batch // bb >= 2:
            return bb
    return 1


def prepare_params(params, n_head, matmul_dtype):
    """Host-side (free) weight re-layout + scale folding.

    (C, C) column blocks h*D..(h+1)*D of wq/wk/wv become (H, C, D); row blocks of wp
    become (H, D, C).  1/sqrt(head_size) is folded into wq.  Weights are cast to the
    MXU operand dtype so their DMA is half-width in bf16 mode.
    """
    C = params["wq"].shape[0]
    D = C // n_head

    def cols_to_heads(w):                                    # (C, H*D) -> (H, C, D)
        return jnp.transpose(w.reshape(C, n_head, D), (1, 0, 2))

    wq_h = cols_to_heads(params["wq"] * (D ** -0.5)).astype(matmul_dtype)
    wk_h = cols_to_heads(params["wk"]).astype(matmul_dtype)
    wv_h = cols_to_heads(params["wv"]).astype(matmul_dtype)
    wp_h = params["wp"].reshape(n_head, D, C).astype(matmul_dtype)  # rows h*D+d -> (h,d,:)
    return wq_h, wk_h, wv_h, wp_h, params["bp"]


def mha_forward(x, params, n_head, *, matmul_dtype=jnp.bfloat16, block_b=None):
    B, T, C = x.shape
    assert C % n_head == 0
    D = C // n_head
    if block_b is None:
        block_b = _auto_block_b(B)
    assert B % block_b == 0, "batch must be divisible by block_b"

    wq_h, wk_h, wv_h, wp_h, bp = prepare_params(params, n_head, matmul_dtype)
    kernel = functools.partial(mha_kernel, n_head=n_head, matmul_dtype=matmul_dtype)

    # Weights/bias: full-array blocks with constant index_map -> DMA'd once, resident
    # in VMEM across all grid steps.
    w_spec = pl.BlockSpec((n_head, C, D), lambda i: (0, 0, 0))
    in_specs = [
        pl.BlockSpec((block_b, T, C), lambda i: (i, 0, 0)),      # x
        w_spec, w_spec, w_spec,                                  # wq, wk, wv
        pl.BlockSpec((n_head, D, C), lambda i: (0, 0, 0)),       # wp
        pl.BlockSpec((1, C), lambda i: (0, 0)),                  # bias
    ]
    out_specs = pl.BlockSpec((block_b, T, C), lambda i: (i, 0, 0))

    flops = 8 * B * T * C * C + 4 * B * n_head * T * T * D
    bytes_accessed = 4 * (2 * B * T * C + 4 * C * C + C)
    cost = pl.CostEstimate(flops=flops,
                           transcendentals=B * n_head * T * T,
                           bytes_accessed=bytes_accessed)

    return pl.pallas_call(
        kernel,
        out_shape=jax.ShapeDtypeStruct((B, T, C), x.dtype),
        grid_spec=pltpu.PrefetchScalarGridSpec(
            num_scalar_prefetch=0,
            grid=(B // block_b,),
            in_specs=in_specs,
            out_specs=out_specs,
        ),
        compiler_params=pltpu.CompilerParams(
            dimension_semantics=("parallel",),      # batch blocks are independent
            vmem_limit_bytes=32 * 1024 * 1024,      # raise for large-T flash-tiled variants
        ),
        cost_estimate=cost,
    )(x, wq_h, wk_h, wv_h, wp_h, bp)


def mha_reference(x, params, n_head):
    """Pure-JAX reference (matches the PyTorch MultiHeadAttention forward in eval mode)."""
    B, T, C = x.shape
    D = C // n_head
    q = x @ params["wq"]
    k = x @ params["wk"]
    v = x @ params["wv"]
    q = q.reshape(B, T, n_head, D).transpose(0, 2, 1, 3)
    k = k.reshape(B, T, n_head, D).transpose(0, 2, 1, 3)
    v = v.reshape(B, T, n_head, D).transpose(0, 2, 1, 3)
    wei = jnp.einsum("bhqd,bhkd->bhqk", q, k) * D ** (-0.5)
    mask = jnp.tril(jnp.ones((T, T), dtype=bool))
    wei = jnp.where(mask, wei, -jnp.inf)
    wei = jax.nn.softmax(wei, axis=-1)
    out = jnp.einsum("bhqk,bhkd->bhqd", wei, v)
    out = out.transpose(0, 2, 1, 3).reshape(B, T, C)
    return out @ params["wp"] + params["bp"]


def make_params(key, n_embd):
    ks = jax.random.split(key, 5)
    s = 0.02
    return {
        "wq": s * jax.random.normal(ks[0], (n_embd, n_embd), jnp.float32),
        "wk": s * jax.random.normal(ks[1], (n_embd, n_embd), jnp.float32),
        "wv": s * jax.random.normal(ks[2], (n_embd, n_embd), jnp.float32),
        "wp": s * jax.random.normal(ks[3], (n_embd, n_embd), jnp.float32),
        "bp": s * jax.random.normal(ks[4], (1, n_embd), jnp.float32),
    }


if __name__ == "__main__":
    B, T, C = 4, 8, 32          # batch, seq (== block_size), n_embd
    n_head = 4                  # head_size = 8; auto block_b = 2 -> grid = (2,)
    key = jax.random.PRNGKey(0)
    kx, kp = jax.random.split(key)
    x = jax.random.normal(kx, (B, T, C), jnp.float32)
    params = make_params(kp, C)

    ref = mha_reference(x, params, n_head)

    # Default path: bf16 MXU operands (recommended on v6e/v7x, fine on v5e), f32 accum.
    out_bf16 = jax.block_until_ready(mha_forward(x, params, n_head))
    assert out_bf16.shape == (B, T, C)
    assert jnp.allclose(out_bf16, ref, atol=5e-3, rtol=5e-3), \
        f"bf16 max abs err {jnp.max(jnp.abs(out_bf16 - ref))}"

    # Full-f32 operands for a tight check against the f32 reference.
    out_f32 = jax.block_until_ready(
        mha_forward(x, params, n_head, matmul_dtype=jnp.float32))
    assert jnp.allclose(out_f32, ref, atol=1e-3, rtol=1e-3), \
        f"f32 max abs err {jnp.max(jnp.abs(out_f32 - ref))}"

    print("KERNEL_OK")
</pallas_src>

<mosaic_0001>
module attributes {stable_mosaic.version = 11 : i64} {
  func.func @mha_kernel(%arg0: i32, %arg1: memref<2x8x32xf32, #tpu.memory_space<vmem>>, %arg2: memref<4x32x8xbf16, #tpu.memory_space<vmem>>, %arg3: memref<4x32x8xbf16, #tpu.memory_space<vmem>>, %arg4: memref<4x32x8xbf16, #tpu.memory_space<vmem>>, %arg5: memref<4x8x32xbf16, #tpu.memory_space<vmem>>, %arg6: memref<1x32xf32, #tpu.memory_space<vmem>>, %arg7: memref<2x8x32xf32, #tpu.memory_space<vmem>>) attributes {dimension_semantics = [#tpu.dimension_semantics<parallel>], iteration_bounds = array<i64: 2>, scalar_prefetch = 0 : i64, scratch_operands = 0 : i64, tpu.core_type = #tpu.core_type<tc>, window_params = [{transform_indices = @transform_0, window_bounds = array<i64: 2, 8, 32>}, {pipeline_mode = #tpu.pipeline_mode<synchronous>, transform_indices = @transform_1, window_bounds = array<i64: 4, 32, 8>}, {pipeline_mode = #tpu.pipeline_mode<synchronous>, transform_indices = @transform_2, window_bounds = array<i64: 4, 32, 8>}, {pipeline_mode = #tpu.pipeline_mode<synchronous>, transform_indices = @transform_3, window_bounds = array<i64: 4, 32, 8>}, {pipeline_mode = #tpu.pipeline_mode<synchronous>, transform_indices = @transform_4, window_bounds = array<i64: 4, 8, 32>}, {pipeline_mode = #tpu.pipeline_mode<synchronous>, transform_indices = @transform_5, window_bounds = array<i64: 1, 32>}, {transform_indices = @transform_6, window_bounds = array<i64: 2, 8, 32>}]} {
    %c0 = arith.constant 0 : index
    %c0_0 = arith.constant 0 : index
    %c0_1 = arith.constant 0 : index
    %0 = vector.load %arg2[%c0, %c0_0, %c0_1] : memref<4x32x8xbf16, #tpu.memory_space<vmem>>, vector<4x32x8xbf16>
    %c0_2 = arith.constant 0 : index
    %c0_3 = arith.constant 0 : index
    %c0_4 = arith.constant 0 : index
    %1 = vector.load %arg3[%c0_2, %c0_3, %c0_4] : memref<4x32x8xbf16, #tpu.memory_space<vmem>>, vector<4x32x8xbf16>
    %c0_5 = arith.constant 0 : index
    %c0_6 = arith.constant 0 : index
    %c0_7 = arith.constant 0 : index
    %2 = vector.load %arg4[%c0_5, %c0_6, %c0_7] : memref<4x32x8xbf16, #tpu.memory_space<vmem>>, vector<4x32x8xbf16>
    %c0_8 = arith.constant 0 : index
    %c0_9 = arith.constant 0 : index
    %c0_10 = arith.constant 0 : index
    %3 = vector.load %arg5[%c0_8, %c0_9, %c0_10] : memref<4x8x32xbf16, #tpu.memory_space<vmem>>, vector<4x8x32xbf16>
    %c0_11 = arith.constant 0 : index
    %c0_12 = arith.constant 0 : index
    %4 = vector.load %arg6[%c0_11, %c0_12] : memref<1x32xf32, #tpu.memory_space<vmem>>, vector<1x32xf32>
    %5 = tpu.iota {dimensions = array<i32: 0>} : vector<8x8xi32>
    %6 = tpu.iota {dimensions = array<i32: 1>} : vector<8x8xi32>
    %7 = arith.cmpi sge, %5, %6 : vector<8x8xi32>
    %8 = vector.shape_cast %7 : vector<8x8xi1> to vector<1x8x8xi1>
    %c0_13 = arith.constant 0 : index
    %c0_14 = arith.constant 0 : index
    %c0_15 = arith.constant 0 : index
    %9 = vector.load %arg1[%c0_13, %c0_14, %c0_15] : memref<2x8x32xf32, #tpu.memory_space<vmem>>, vector<1x8x32xf32>
    %10 = vector.shape_cast %9 : vector<1x8x32xf32> to vector<8x32xf32>
    %11 = arith.truncf %10 : vector<8x32xf32> to vector<8x32xbf16>
    %12 = vector.shape_cast %11 : vector<8x32xbf16> to vector<1x8x32xbf16>
    %13 = vector.shape_cast %12 : vector<1x8x32xbf16> to vector<1x8x32xbf16>
    %14 = vector.broadcast %13 : vector<1x8x32xbf16> to vector<4x8x32xbf16>
    "tpu.trace_start"() <{level = 10 : i32, message = "htc,hcd->htd"}> : () -> ()
    %cst = arith.constant dense<0.000000e+00> : vector<4x8x8xf32>
    %15 = tpu.matmul %14, %0, %cst {dimension_numbers = #tpu.dot_dimension_numbers<[2], [1], [1], [2], [0, 0, 0, 1, 1, 2], [0], [0]>} : vector<4x8x32xbf16>, vector<4x32x8xbf16>, vector<4x8x8xf32> -> vector<4x8x8xf32>
    %cst_16 = arith.constant dense<0.000000e+00> : vector<4x8x8xf32>
    %16 = tpu.matmul %14, %1, %cst_16 {dimension_numbers = #tpu.dot_dimension_numbers<[2], [1], [1], [2], [0, 0, 0, 1, 1, 2], [0], [0]>} : vector<4x8x32xbf16>, vector<4x32x8xbf16>, vector<4x8x8xf32> -> vector<4x8x8xf32>
    %cst_17 = arith.constant dense<0.000000e+00> : vector<4x8x8xf32>
    %17 = tpu.matmul %14, %2, %cst_17 {dimension_numbers = #tpu.dot_dimension_numbers<[2], [1], [1], [2], [0, 0, 0, 1, 1, 2], [0], [0]>} : vector<4x8x32xbf16>, vector<4x32x8xbf16>, vector<4x8x8xf32> -> vector<4x8x8xf32>
    "tpu.trace_stop"() : () -> ()
    %18 = arith.truncf %15 : vector<4x8x8xf32> to vector<4x8x8xbf16>
    %19 = arith.truncf %16 : vector<4x8x8xf32> to vector<4x8x8xbf16>
    "tpu.trace_start"() <{level = 10 : i32, message = "hqd,hkd->hqk"}> : () -> ()
    %cst_18 = arith.constant dense<0.000000e+00> : vector<4x8x8xf32>
    %20 = tpu.matmul %18, %19, %cst_18 {dimension_numbers = #tpu.dot_dimension_numbers<[2], [2], [1], [1], [0, 0, 0, 1, 1, 1], [0], [0]>} : vector<4x8x8xbf16>, vector<4x8x8xbf16>, vector<4x8x8xf32> -> vector<4x8x8xf32>
    %cst_19 = arith.constant -1.000000e+30 : f32
    "tpu.trace_stop"() : () -> ()
    %21 = vector.shape_cast %8 : vector<1x8x8xi1> to vector<1x8x8xi1>
    %22 = vector.broadcast %21 : vector<1x8x8xi1> to vector<4x8x8xi1>
    %23 = vector.broadcast %cst_19 : f32 to vector<4x8x8xf32>
    %24 = arith.select %22, %20, %23 : vector<4x8x8xi1>, vector<4x8x8xf32>
    %cst_20 = arith.constant dense<0xFF800000> : vector<4x8xf32>
    %25 = vector.multi_reduction <maximumf>, %24, %cst_20 [2] : vector<4x8x8xf32> to vector<4x8xf32>
    %26 = vector.shape_cast %25 : vector<4x8xf32> to vector<4x8x1xf32>
    %27 = vector.broadcast %26 : vector<4x8x1xf32> to vector<4x8x8xf32>
    %28 = arith.subf %24, %27 : vector<4x8x8xf32>
    %29 = math.exp %28 : vector<4x8x8xf32>
    %cst_21 = arith.constant dense<0.000000e+00> : vector<4x8xf32>
    %30 = vector.multi_reduction <add>, %29, %cst_21 [2] : vector<4x8x8xf32> to vector<4x8xf32>
    %31 = vector.shape_cast %30 : vector<4x8xf32> to vector<4x8x1xf32>
    %32 = vector.broadcast %31 : vector<4x8x1xf32> to vector<4x8x8xf32>
    %33 = arith.divf %29, %32 : vector<4x8x8xf32>
    %34 = arith.truncf %33 : vector<4x8x8xf32> to vector<4x8x8xbf16>
    %35 = arith.truncf %17 : vector<4x8x8xf32> to vector<4x8x8xbf16>
    "tpu.trace_start"() <{level = 10 : i32, message = "hqk,hkd->hqd"}> : () -> ()
    %cst_22 = arith.constant dense<0.000000e+00> : vector<4x8x8xf32>
    %36 = tpu.matmul %34, %35, %cst_22 {dimension_numbers = #tpu.dot_dimension_numbers<[2], [1], [1], [2], [0, 0, 0, 1, 1, 2], [0], [0]>} : vector<4x8x8xbf16>, vector<4x8x8xbf16>, vector<4x8x8xf32> -> vector<4x8x8xf32>
    "tpu.trace_stop"() : () -> ()
    %37 = arith.truncf %36 : vector<4x8x8xf32> to vector<4x8x8xbf16>
    "tpu.trace_start"() <{level = 10 : i32, message = "htd,hdc->htc"}> : () -> ()
    %cst_23 = arith.constant dense<0.000000e+00> : vector<4x8x32xf32>
    %38 = tpu.matmul %37, %3, %cst_23 {dimension_numbers = #tpu.dot_dimension_numbers<[2], [1], [1], [2], [0, 0, 0, 1, 1, 2], [0], [0]>} : vector<4x8x8xbf16>, vector<4x8x32xbf16>, vector<4x8x32xf32> -> vector<4x8x32xf32>
    "tpu.trace_stop"() : () -> ()
    %cst_24 = arith.constant dense<0.000000e+00> : vector<8x32xf32>
    %39 = vector.multi_reduction <add>, %38, %cst_24 [0] : vector<4x8x32xf32> to vector<8x32xf32>
    %40 = vector.broadcast %4 : vector<1x32xf32> to vector<8x32xf32>
    %41 = arith.addf %39, %40 : vector<8x32xf32>
    %c0_25 = arith.constant 0 : index
    %c0_26 = arith.constant 0 : index
    %c0_27 = arith.constant 0 : index
    %42 = vector.load %arg7[%c0_25, %c0_26, %c0_27] : memref<2x8x32xf32, #tpu.memory_space<vmem>>, vector<1x8x32xf32>
    %43 = vector.shape_cast %42 : vector<1x8x32xf32> to vector<8x32xf32>
    %44 = vector.shape_cast %41 : vector<8x32xf32> to vector<1x8x32xf32>
    tpu.vector_store %arg7[%c0_25, %c0_26, %c0_27], %44 {strides = array<i32>} : memref<2x8x32xf32, #tpu.memory_space<vmem>>, vector<1x8x32xf32>,
    %c1 = arith.constant 1 : index
    %c0_28 = arith.constant 0 : index
    %c0_29 = arith.constant 0 : index
    %45 = vector.load %arg1[%c1, %c0_28, %c0_29] : memref<2x8x32xf32, #tpu.memory_space<vmem>>, vector<1x8x32xf32>
    %46 = vector.shape_cast %45 : vector<1x8x32xf32> to vector<8x32xf32>
    %47 = arith.truncf %46 : vector<8x32xf32> to vector<8x32xbf16>
    %48 = vector.shape_cast %47 : vector<8x32xbf16> to vector<1x8x32xbf16>
    %49 = vector.shape_cast %48 : vector<1x8x32xbf16> to vector<1x8x32xbf16>
    %50 = vector.broadcast %49 : vector<1x8x32xbf16> to vector<4x8x32xbf16>
    "tpu.trace_start"() <{level = 10 : i32, message = "htc,hcd->htd"}> : () -> ()
    %cst_30 = arith.constant dense<0.000000e+00> : vector<4x8x8xf32>
    %51 = tpu.matmul %50, %0, %cst_30 {dimension_numbers = #tpu.dot_dimension_numbers<[2], [1], [1], [2], [0, 0, 0, 1, 1, 2], [0], [0]>} : vector<4x8x32xbf16>, vector<4x32x8xbf16>, vector<4x8x8xf32> -> vector<4x8x8xf32>
    %cst_31 = arith.constant dense<0.000000e+00> : vector<4x8x8xf32>
    %52 = tpu.matmul %50, %1, %cst_31 {dimension_numbers = #tpu.dot_dimension_numbers<[2], [1], [1], [2], [0, 0, 0, 1, 1, 2], [0], [0]>} : vector<4x8x32xbf16>, vector<4x32x8xbf16>, vector<4x8x8xf32> -> vector<4x8x8xf32>
    %cst_32 = arith.constant dense<0.000000e+00> : vector<4x8x8xf32>
    %53 = tpu.matmul %50, %2, %cst_32 {dimension_numbers = #tpu.dot_dimension_numbers<[2], [1], [1], [2], [0, 0, 0, 1, 1, 2], [0], [0]>} : vector<4x8x32xbf16>, vector<4x32x8xbf16>, vector<4x8x8xf32> -> vector<4x8x8xf32>
    "tpu.trace_stop"() : () -> ()
    %54 = arith.truncf %51 : vector<4x8x8xf32> to vector<4x8x8xbf16>
    %55 = arith.truncf %52 : vector<4x8x8xf32> to vector<4x8x8xbf16>
    "tpu.trace_start"() <{level = 10 : i32, message = "hqd,hkd->hqk"}> : () -> ()
    %cst_33 = arith.constant dense<0.000000e+00> : vector<4x8x8xf32>
    %56 = tpu.matmul %54, %55, %cst_33 {dimension_numbers = #tpu.dot_dimension_numbers<[2], [2], [1], [1], [0, 0, 0, 1, 1, 1], [0], [0]>} : vector<4x8x8xbf16>, vector<4x8x8xbf16>, vector<4x8x8xf32> -> vector<4x8x8xf32>
    %cst_34 = arith.constant -1.000000e+30 : f32
    "tpu.trace_stop"() : () -> ()
    %57 = vector.shape_cast %8 : vector<1x8x8xi1> to vector<1x8x8xi1>
    %58 = vector.broadcast %57 : vector<1x8x8xi1> to vector<4x8x8xi1>
    %59 = vector.broadcast %cst_34 : f32 to vector<4x8x8xf32>
    %60 = arith.select %58, %56, %59 : vector<4x8x8xi1>, vector<4x8x8xf32>
    %cst_35 = arith.constant dense<0xFF800000> : vector<4x8xf32>
    %61 = vector.multi_reduction <maximumf>, %60, %cst_35 [2] : vector<4x8x8xf32> to vector<4x8xf32>
    %62 = vector.shape_cast %61 : vector<4x8xf32> to vector<4x8x1xf32>
    %63 = vector.broadcast %62 : vector<4x8x1xf32> to vector<4x8x8xf32>
    %64 = arith.subf %60, %63 : vector<4x8x8xf32>
    %65 = math.exp %64 : vector<4x8x8xf32>
    %cst_36 = arith.constant dense<0.000000e+00> : vector<4x8xf32>
    %66 = vector.multi_reduction <add>, %65, %cst_36 [2] : vector<4x8x8xf32> to vector<4x8xf32>
    %67 = vector.shape_cast %66 : vector<4x8xf32> to vector<4x8x1xf32>
    %68 = vector.broadcast %67 : vector<4x8x1xf32> to vector<4x8x8xf32>
    %69 = arith.divf %65, %68 : vector<4x8x8xf32>
    %70 = arith.truncf %69 : vector<4x8x8xf32> to vector<4x8x8xbf16>
    %71 = arith.truncf %53 : vector<4x8x8xf32> to vector<4x8x8xbf16>
    "tpu.trace_start"() <{level = 10 : i32, message = "hqk,hkd->hqd"}> : () -> ()
    %cst_37 = arith.constant dense<0.000000e+00> : vector<4x8x8xf32>
    %72 = tpu.matmul %70, %71, %cst_37 {dimension_numbers = #tpu.dot_dimension_numbers<[2], [1], [1], [2], [0, 0, 0, 1, 1, 2], [0], [0]>} : vector<4x8x8xbf16>, vector<4x8x8xbf16>, vector<4x8x8xf32> -> vector<4x8x8xf32>
    "tpu.trace_stop"() : () -> ()
    %73 = arith.truncf %72 : vector<4x8x8xf32> to vector<4x8x8xbf16>
    "tpu.trace_start"() <{level = 10 : i32, message = "htd,hdc->htc"}> : () -> ()
    %cst_38 = arith.constant dense<0.000000e+00> : vector<4x8x32xf32>
    %74 = tpu.matmul %73, %3, %cst_38 {dimension_numbers = #tpu.dot_dimension_numbers<[2], [1], [1], [2], [0, 0, 0, 1, 1, 2], [0], [0]>} : vector<4x8x8xbf16>, vector<4x8x32xbf16>, vector<4x8x32xf32> -> vector<4x8x32xf32>
    "tpu.trace_stop"() : () -> ()
    %cst_39 = arith.constant dense<0.000000e+00> : vector<8x32xf32>
    %75 = vector.multi_reduction <add>, %74, %cst_39 [0] : vector<4x8x32xf32> to vector<8x32xf32>
    %76 = vector.broadcast %4 : vector<1x32xf32> to vector<8x32xf32>
    %77 = arith.addf %75, %76 : vector<8x32xf32>
    %c1_40 = arith.constant 1 : index
    %c0_41 = arith.constant 0 : index
    %c0_42 = arith.constant 0 : index
    %78 = vector.load %arg7[%c1_40, %c0_41, %c0_42] : memref<2x8x32xf32, #tpu.memory_space<vmem>>, vector<1x8x32xf32>
    %79 = vector.shape_cast %78 : vector<1x8x32xf32> to vector<8x32xf32>
    %80 = vector.shape_cast %77 : vector<8x32xf32> to vector<1x8x32xf32>
    tpu.vector_store %arg7[%c1_40, %c0_41, %c0_42], %80 {strides = array<i32>} : memref<2x8x32xf32, #tpu.memory_space<vmem>>, vector<1x8x32xf32>,
    return
  }
  func.func @transform_0(%arg0: i32) -> (i32, i32, i32) {
    %c0_i32 = arith.constant 0 : i32
    %c0_i32_0 = arith.constant 0 : i32
    %c0_i32_1 = arith.constant 0 : i32
    return %arg0, %c0_i32, %c0_i32_0 : i32, i32, i32
  }
  func.func @transform_1(%arg0: i32) -> (i32, i32, i32) {
    %c0_i32 = arith.constant 0 : i32
    %c0_i32_0 = arith.constant 0 : i32
    %c0_i32_1 = arith.constant 0 : i32
    %c0_i32_2 = arith.constant 0 : i32
    return %c0_i32, %c0_i32_0, %c0_i32_1 : i32, i32, i32
  }
  func.func @transform_2(%arg0: i32) -> (i32, i32, i32) {
    %c0_i32 = arith.constant 0 : i32
    %c0_i32_0 = arith.constant 0 : i32
    %c0_i32_1 = arith.constant 0 : i32
    %c0_i32_2 = arith.constant 0 : i32
    return %c0_i32, %c0_i32_0, %c0_i32_1 : i32, i32, i32
  }
  func.func @transform_3(%arg0: i32) -> (i32, i32, i32) {
    %c0_i32 = arith.constant 0 : i32
    %c0_i32_0 = arith.constant 0 : i32
    %c0_i32_1 = arith.constant 0 : i32
    %c0_i32_2 = arith.constant 0 : i32
    return %c0_i32, %c0_i32_0, %c0_i32_1 : i32, i32, i32
  }
  func.func @transform_4(%arg0: i32) -> (i32, i32, i32) {
    %c0_i32 = arith.constant 0 : i32
    %c0_i32_0 = arith.constant 0 : i32
    %c0_i32_1 = arith.constant 0 : i32
    %c0_i32_2 = arith.constant 0 : i32
    return %c0_i32, %c0_i32_0, %c0_i32_1 : i32, i32, i32
  }
  func.func @transform_5(%arg0: i32) -> (i32, i32) {
    %c0_i32 = arith.constant 0 : i32
    %c0_i32_0 = arith.constant 0 : i32
    %c0_i32_1 = arith.constant 0 : i32
    return %c0_i32, %c0_i32_0 : i32, i32
  }
  func.func @transform_6(%arg0: i32) -> (i32, i32, i32) {
    %c0_i32 = arith.constant 0 : i32
    %c0_i32_0 = arith.constant 0 : i32
    %c0_i32_1 = arith.constant 0 : i32
    return %arg0, %c0_i32, %c0_i32_0 : i32, i32, i32
  }
}

</mosaic_0001>

<bundles_post_ra>
// kernel: tpu_custom_call.1
= control target key start
LH: loop header
LB: loop body
LE: loop exit
PB: predicated region body
PF: predicated region fallthrough
CT: control target
= control target key end

     0   :  { %11 = vsyncpa [#allocation3], 0  ;;  %s2356_s0 = inlined_call_operand.vmem [shape: f32[4,8,32], index: 0, kind: input, shape index: {}]   ;;  %s2357_s1 = inlined_call_operand.vmem [shape: bf16[4,32,8], index: 1, kind: input, shape index: {}]   ;;  %s2358_s2 = inlined_call_operand.vmem [shape: bf16[4,32,8], index: 2, kind: input, shape index: {}]   ;;  %s2359_s3 = inlined_call_operand.vmem [shape: bf16[4,32,8], index: 3, kind: input, shape index: {}]   ;;  %s2360_s4 = inlined_call_operand.vmem [shape: bf16[4,8,32], index: 4, kind: input, shape index: {}]   ;;  %s2361_s5 = inlined_call_operand.vmem [shape: f32[1,32], index: 5, kind: input, shape index: {}]   ;;  %s2362_s6 = inlined_call_operand.hbm [shape: f32[4,8,32], index: 6, kind: output, shape index: {}]  }
   0x1   :  { %13 = vsyncpa [#allocation3 + $0x1], 0  ;;  %s1926_s21 = smov 0   ;;  %s1928_s22 = smov 0  }
   0x2   :  { %s1930_s23 = smov 0   ;;  %s1932_s24 = smov 0  }
   0x3 LB: > { %s1947_s25 = sadd.s32 4294967295, %s1887_s24   ;;  %s1568_s26 = sadd.s32 4294967294, %s1887_s24   ;;  %s1887_s24 = sphi %s1932_s24, %s2370_s24   ;;  %s1883_s23 = sphi %s1930_s23, %s2369_s23   ;;  %s1879_s22 = sphi %s1928_s22, %s2368_s22   ;;  %s1875_s21 = sphi %s1926_s21, %s2367_s21  }
   0x4   : > { %s1951_s27 = sadd.s32 1, %s1887_s24   ;;  %s157_s28 = sadd.s32 1, %s1883_s23 }
   0x5   : > { %s154_s29 = ssub.s32 %s1887_s24, %s1951_s27  ;;  %p167_p0 = scmp.ne.s32.totalorder %s1883_s23, %s1879_s22 }
   0x6   : > { %p155_p1 = scmp.eq.s32.totalorder %s154_s29, 0  ;;  %p168_p2 = scmp.eq.s32.totalorder %s1947_s25, 1 }
   0x7   : > { %p173_p3 = scmp.ne.s32.totalorder %s1879_s22, %s1875_s21  ;;  %p174_p4 = scmp.eq.s32.totalorder %s1568_s26, 1 }
   0x8   : > { %s1962_s30 = scalar_select %p155_p1, %s1883_s23, %s157_s28  }
   0x9   : > { %p1964_p5 = por %p168_p2, %p167_p0  ;;  %p1968_p6 = por %p174_p4, %p173_p3 }
   0xa   : > { %p1571_p7 = scmp.ge.s32.totalorder %s1887_s24, 1  ;;  %p216_p8 = scmp.lt.s32.totalorder %s1887_s24, 3 }
   0xc   : > { %p217_p9 = pnand %p1571_p7, %p216_p8 }
   0xd   : > { %s1573_s15 = sshll.u32 (!%p217_p9), %s1947_s25, 1  ;;  %s1750_s17 = sshll.u32 (!%p217_p9), %s1947_s25, 4 }
   0xe   : > { %220 = sbr.rel (%p217_p9) target bundleno = 1577 (0x629), region = 44  ;;  %p247_p10 = scmp.lt.s32.totalorder (!%p217_p9), %s1573_s15, 3 }
   0xf   : > { %s1502_s20 = scalar_lea.hbm (!%p217_p9), %s2362_s6, %s1750_s17 }
  0x10   : > { %s1505_s25 = sshll.u32 (!%p217_p9), %s1502_s20, 4  ;;  %s1506_s25 = int_to_ptr.hbm [resolvable:$true] %s1505_s25 }
  0x13   : > { %v1977_v0 = vld [vmem:[%s2357_s1 + $0x8] sm:$0xff]  ;;  %v1987_v2 = vld [vmem:[%s2357_s1 + $0x38] sm:$0xff]  ;;  %v1995_v3 = vld [vmem:[%s2357_s1] sm:$0xff]  ;;  %s2372_s15 = smov (!%p247_p10, %s1573_s15), 3  ;;  %vm326_vm0 = vcmask 261120   ;;  %vm626_vm1 = vcmask 64512  }
  0x14   : > { %v1982_v1 = vld [vmem:[%s2357_s1 + $0x28] sm:$0xff]  ;;  %336 = vmatpush.bf16.msra.mxu0 %v1977_v0  ;;  %v2000_v4 = vld [vmem:[%s2357_s1 + $0x20] sm:$0xff]  ;;  %v2005_v5 = vld [vmem:[%s2357_s1 + $0x18] sm:$0xff]  ;;  %411 = vmatpush.bf16.msra.mxu3 %v1987_v2  ;;  %s1574_s16 = sshll.u32 %s2372_s15, 3  ;;  %vm816_vm2 = vcmask 1043456   ;;  %s1839_s15 = sshra.s32 %s1506_s25, 4  ;;  %s1840_s15 = int_to_ptr.hbm [resolvable:$true] %s1839_s15 }
  0x15   : > { %386 = vmatpush.bf16.msra.mxu2 %v1982_v1  ;;  %v2011_v6 = vld [vmem:[%s2357_s1 + $0x30] sm:$0xff]  ;;  %v2016_v7 = vld [vmem:[%s2358_s2 + $0x8] sm:$0xff]  ;;  %361 = vmatpush.bf16.msra.mxu1 %v2005_v5  ;;  %v2032_v10 = vld [vmem:[%s2358_s2 + $0x38] sm:$0xff]  ;;  %s2044_s29 = scalar_lea.vmem %s2356_s0, %s1574_s16  ;;  %s1841_s9 = scalar_lea.hbm %s1840_s15, 16 }
  0x16   : > { %v2022_v8 = vld [vmem:[%s2357_s1 + $0x10] sm:$0xff]  ;;  %v2027_v9 = vld [vmem:[%s2358_s2 + $0x28] sm:$0xff]  ;;  %v2037_v11 = vld [vmem:[%s2358_s2 + $0x18] sm:$0xff]  ;;  %p1842_p11 = scmp.ne.s32.totalorder %s1840_s15, %s1841_s9  ;;  %p1846_p0 = scmp.lt.s32.totalorder %s1840_s15, %s2362_s6 }
  0x17   : > { %v312_v12 = vld [vmem:[%s2044_s29] sm:$0xff]  ;;  %v2065_v16 = vld [vmem:[%s2358_s2 + $0x30] sm:$0xff]  ;;  %v2088_v18 = vld [vmem:[%s2359_s3 + $0x28] sm:$0xff] }
  0x18   : > { %337 = vmatpush.bf16.msra.mxu0 %v1995_v3  ;;  %412 = vmatpush.bf16.msra.mxu3 %v2011_v6  ;;  %v313_v13 = vpack.c.bf16 %v312_v12, %v312_v12  ;;  %v2054_v14 = vld [vmem:[%s2358_s2] sm:$0xff]  ;;  %v2071_v17 = vld [vmem:[%s2358_s2 + $0x10] sm:$0xff]  ;;  %v2093_v19 = vld [vmem:[%s2359_s3 + $0x8] sm:$0xff]  ;;  %p1843_p12 = pnand %p1842_p11, %p1964_p5 }
  0x19   : > { %387 = vmatpush.bf16.msra.mxu2 %v2000_v4  ;;  %362 = vmatpush.bf16.msra.mxu1 %v2022_v8  ;;  %v2059_v15 = vld [vmem:[%s2358_s2 + $0x20] sm:$0xff]  ;;  %v2111_v22 = vld [vmem:[%s2359_s3 + $0x38] sm:$0xff]  ;;  %v2126_v24 = vld [vmem:[%s2359_s3 + $0x30] sm:$0xff] }
  0x1a   : > { %v2100_v20 = vld [vmem:[%s2359_s3 + $0x20] sm:$0xff]  ;;  %v2116_v23 = vld [vmem:[%s2359_s3 + $0x18] sm:$0xff]  ;;  %v2132_v25 = vld [vmem:[%s2359_s3 + $0x10] sm:$0xff]  ;;  %p1844_p13 = pneg %p1843_p12 }
  0x1b   : > { %1583 = vmatmul.msk.bf16.vlgmr.msra.gmra.mxu0 %vm326_vm0, %v313_v13  ;;  %1610 = vmatmul.msk.bf16.vlgmr.msra.gmra.mxu3 %vm326_vm0, %v313_v13  ;;  %v2106_v21 = vld [vmem:[%s2359_s3] sm:$0xff] }
  0x1c   : > { %436 = vmatpush.bf16.msrb.mxu0 %v2016_v7  ;;  %511 = vmatpush.bf16.msrb.mxu3 %v2032_v10 }
  0x1d   : > { %486 = vmatpush.bf16.msrb.mxu2 %v2027_v9  ;;  %461 = vmatpush.bf16.msrb.mxu1 %v2037_v11 }
  0x1e   : > { %1601 = vmatmul.msk.bf16.vlgmr.msra.gmra.mxu2 %vm326_vm0, %v313_v13  ;;  %1592 = vmatmul.msk.bf16.vlgmr.msra.gmra.mxu1 %vm326_vm0, %v313_v13 }
  0x20   : > { %437 = vmatpush.bf16.msrb.mxu0 %v2054_v14  ;;  %512 = vmatpush.bf16.msrb.mxu3 %v2065_v16 }
  0x21   : > { %487 = vmatpush.bf16.msrb.mxu2 %v2059_v15  ;;  %462 = vmatpush.bf16.msrb.mxu1 %v2071_v17 }
  0x24   : > { %536 = vmatpush.bf16.msra.mxu0 %v2093_v19  ;;  %611 = vmatpush.bf16.msra.mxu3 %v2111_v22 }
  0x25   : > { %586 = vmatpush.bf16.msra.mxu2 %v2088_v18  ;;  %561 = vmatpush.bf16.msra.mxu1 %v2116_v23 }
  0x28   : > { %537 = vmatpush.bf16.msra.mxu0 %v2106_v21  ;;  %612 = vmatpush.bf16.msra.mxu3 %v2126_v24 }
  0x29   : > { %587 = vmatpush.bf16.msra.mxu2 %v2100_v20  ;;  %562 = vmatpush.bf16.msra.mxu1 %v2132_v25 }
  0x2b   : > { %1619 = vmatmul.msk.bf16.vlgmr.msrb.gmra.mxu0 %vm326_vm0, %v313_v13  ;;  %1646 = vmatmul.msk.bf16.vlgmr.msrb.gmra.mxu3 %vm326_vm0, %v313_v13 }
  0x2e   : > { %1637 = vmatmul.msk.bf16.vlgmr.msrb.gmra.mxu2 %vm326_vm0, %v313_v13  ;;  %1628 = vmatmul.msk.bf16.vlgmr.msrb.gmra.mxu1 %vm326_vm0, %v313_v13 }
  0x3b   : > { %1655 = vmatmul.msk.bf16.vlgmr.msra.gmra.mxu0 %vm326_vm0, %v313_v13  ;;  %1682 = vmatmul.msk.bf16.vlgmr.msra.gmra.mxu3 %vm326_vm0, %v313_v13 }
  0x3e   : > { %1673 = vmatmul.msk.bf16.vlgmr.msra.gmra.mxu2 %vm326_vm0, %v313_v13  ;;  %1664 = vmatmul.msk.bf16.vlgmr.msra.gmra.mxu1 %vm326_vm0, %v313_v13 }
  0x98   : > { %v339_v26 = vpop.f32.mrf.mxu0 }
  0x99   : > { %v618_v41 = vpack.c.bf16 %v339_v26, %v339_v26 }
  0x9b   : > { %v364_v27 = vpop.f32.mrf.mxu1 }
  0x9c   : > { %v619_v44 = vpack.c.bf16 %v364_v27, %v364_v27 }
  0x9e   : > { %v414_v29 = vpop.f32.mrf.mxu3 }
  0x9f   : > { %v621_v53 = vpack.c.bf16 %v414_v29, %v414_v29 }
  0xa0   : > { %v341_v30 = vpop.f32.mrf.mxu0 }
  0xa1   : > { %v389_v28 = vpop.f32.mrf.mxu2  ;;  %v307_v30 = vlaneseq }
  0xa2   : > { %v620_v51 = vpack.c.bf16 %v389_v28, %v389_v28 }
  0xa3   : > { %v366_v31 = vpop.f32.mrf.mxu1 }
  0xa4   : > { %v308_v31 = vshrl.u32 %v307_v30, 7 }
  0xa6   : > { %v416_v33 = vpop.f32.mrf.mxu3 }
  0xa8   : > { %v439_v34 = vpop.f32.mrf.mxu0 }
  0xa9   : > { %v391_v32 = vpop.f32.mrf.mxu2  ;;  %v622_v35 = vpack.c.bf16 %v439_v34, %v439_v34 }
  0xaa   : > { %v310_v32 = vand.u32 127, %v307_v30 }
  0xab   : > { %v464_v36 = vpop.f32.mrf.mxu1  ;;  %v631_v38 = vsel %vm626_vm1, %v622_v35, 0 }
  0xac   : > { %v623_v37 = vpack.c.bf16 %v464_v36, %v464_v36  ;;  %640 = vmatpush.bf16.xpose.msrb.mxu0 %v631_v38  ;;  %vm2149_vm3 = vcmp.ge.s32.totalorder %v308_v31, %v310_v32 }
  0xae   : > { %v650_v39 = vsel %vm626_vm1, %v623_v37, 0  ;;  %v514_v43 = vpop.f32.mrf.mxu3 }
  0xaf   : > { %659 = vmatpush.bf16.xpose.msrb.mxu1 %v650_v39  ;;  %v625_v45 = vpack.c.bf16 %v514_v43, %v514_v43 }
  0xb0   : > { %v441_v46 = vpop.f32.mrf.mxu0 }
  0xb1   : > { %v489_v40 = vpop.f32.mrf.mxu2  ;;  %v688_v49 = vsel %vm626_vm1, %v625_v45, 0 }
  0xb2   : > { %v624_v42 = vpack.c.bf16 %v489_v40, %v489_v40  ;;  %697 = vmatpush.bf16.xpose.msrb.mxu3 %v688_v49 }
  0xb3   : > { %v466_v48 = vpop.f32.mrf.mxu1  ;;  %1683 = vmatmul.msk.bf16.vlgmr.msrb.gmra.mxu0 %vm626_vm1, %v618_v41 }
  0xb4   : > { %v669_v47 = vsel %vm626_vm1, %v624_v42, 0 }
  0xb5   : > { %678 = vmatpush.bf16.xpose.msrb.mxu2 %v669_v47 }
  0xb6   : > { %1684 = vmatmul.msk.bf16.vlgmr.msrb.gmra.mxu1 %vm626_vm1, %v619_v44  ;;  %v516_v52 = vpop.f32.mrf.mxu3 }
  0xb8   : > { %v539_v54 = vpop.f32.mrf.mxu0 }
  0xb9   : > { %v491_v50 = vpop.f32.mrf.mxu2  ;;  %1686 = vmatmul.msk.bf16.vlgmr.msrb.gmra.mxu3 %vm626_vm1, %v621_v53  ;;  %v809_v55 = vpack.c.bf16 %v539_v54, %v539_v54 }
  0xbb   : > { %v818_v56 = vsel %vm816_vm2, %v809_v55, 0  ;;  %v564_v61 = vpop.f32.mrf.mxu1 }
  0xbc   : > { %1685 = vmatmul.msk.bf16.vlgmr.msrb.gmra.mxu2 %vm626_vm1, %v620_v51  ;;  %827 = vmatpush.bf16.msra.mxu0 %v818_v56  ;;  %v810_v62 = vpack.c.bf16 %v564_v61, %v564_v61 }
  0xbe   : > { %v837_v63 = vsel %vm816_vm2, %v810_v62, 0  ;;  %v614_v13 = vpop.f32.mrf.mxu3 }
  0xbf   : > { %846 = vmatpush.bf16.msra.mxu1 %v837_v63  ;;  %v812_v26 = vpack.c.bf16 %v614_v13, %v614_v13 }
  0xc0   : > { %v541_v60 = vpop.f32.mrf.mxu0 }
  0xc1   : > { %v589_v57 = vpop.f32.mrf.mxu2  ;;  %v875_v27 = vsel %vm816_vm2, %v812_v26, 0 }
  0xc2   : > { %v811_v58 = vpack.c.bf16 %v589_v57, %v589_v57  ;;  %884 = vmatpush.bf16.msra.mxu3 %v875_v27 }
  0xc3   : > { %v566_v28 = vpop.f32.mrf.mxu1 }
  0xc4   : > { %v856_v59 = vsel %vm816_vm2, %v811_v58, 0 }
  0xc5   : > { %865 = vmatpush.bf16.msra.mxu2 %v856_v59 }
  0xc6   : > { %v616_v29 = vpop.f32.mrf.mxu3 }
  0xc9   : > { %v591_v12 = vpop.f32.mrf.mxu2 }
 0x130   : > { %v642_v34 = vpop.f32.mrf.mxu0 }
 0x131   : > { %v705_v35 = vsel %vm2149_vm3, %v642_v34, -1e+30 }
 0x132   : > { %v709_v37 = vsel %vm626_vm1, %v705_v35, -inf }
 0x133   : > { %v661_v36 = vpop.f32.mrf.mxu1  ;;  %710 = vmax.xlane.f32.xlu1 %v709_v37 }
 0x134   : > { %v706_v38 = vsel %vm2149_vm3, %v661_v36, -1e+30 }
 0x135   : > { %v712_v39 = vsel %vm626_vm1, %v706_v38, -inf }
 0x138   : > { %v644_v40 = vpop.f32.mrf.mxu0 }
 0x13b   : > { %v663_v41 = vpop.f32.mrf.mxu1  ;;  %713 = vmax.xlane.f32.xlu1 %v712_v39 }
 0x13c   : > { %v699_v44 = vpop.f32.mrf.mxu3 }
 0x13d   : > { %v708_v46 = vsel %vm2149_vm3, %v699_v44, -1e+30 }
 0x13e   : > { %v718_v49 = vsel %vm626_vm1, %v708_v46, -inf }
 0x13f   : > { %v680_v42 = vpop.f32.mrf.mxu2 }
 0x140   : > { %v707_v43 = vsel %vm2149_vm3, %v680_v42, -1e+30 }
 0x141   : > { %v715_v45 = vsel %vm626_vm1, %v707_v43, -inf }
 0x142   : > { %716 = vmax.xlane.f32.xlu0 %v715_v45 }
 0x144   : > { %v701_v48 = vpop.f32.mrf.mxu3 }
 0x147   : > { %v682_v47 = vpop.f32.mrf.mxu2 }
 0x14a   : > { %719 = vmax.xlane.f32.xlu0 %v718_v49 }
 0x1a6   : > { %v711_v50 = vpop.xlane.xlu1 %710 }
 0x1a7   : > { %v721_v51 = vsub.f32 %v705_v35, %v711_v50 }
 0x1a9   : > { %v725_v52 = vmul.f32 1.442695, %v721_v51 }
 0x1ab   : > { %1793 = vpow2.f32 %v725_v52 }
 0x1ae   : > { %v714_v53 = vpop.xlane.xlu1 %713 }
 0x1af   : > { %v722_v54 = vsub.f32 %v706_v38, %v714_v53 }
 0x1b1   : > { %v1794_v55 = vpop.eup %1793  ;;  %v727_v56 = vmul.f32 1.442695, %v722_v54 }
 0x1b2   : > { %v733_v58 = vsel %vm626_vm1, %v1794_v55, 0.0 }
 0x1b3   : > { %1795 = vpow2.f32 %v727_v56  ;;  %734 = vadd.xlane.f32.xlu0 %v733_v58 }
 0x1b5   : > { %v717_v57 = vpop.xlane.xlu0 %716 }
 0x1b6   : > { %v723_v59 = vsub.f32 %v707_v43, %v717_v57 }
 0x1b8   : > { %v729_v60 = vmul.f32 1.442695, %v723_v59 }
 0x1b9   : > { %v1796_v61 = vpop.eup %1795 }
 0x1ba   : > { %1797 = vpow2.f32 %v729_v60  ;;  %v736_v63 = vsel %vm626_vm1, %v1796_v61, 0.0 }
 0x1bb   : > { %737 = vadd.xlane.f32.xlu1 %v736_v63 }
 0x1bd   : > { %v720_v62 = vpop.xlane.xlu0 %719 }
 0x1be   : > { %v724_v12 = vsub.f32 %v708_v46, %v720_v62 }
 0x1c0   : > { %v2167_v13 = vpop.eup %1797  ;;  %v731_v26 = vmul.f32 1.442695, %v724_v12 }
 0x1c1   : > { %v739_v27 = vsel %vm626_vm1, %v2167_v13, 0.0 }
 0x1c2   : > { %1799 = vpow2.f32 %v731_v26  ;;  %740 = vadd.xlane.f32.xlu2 %v739_v27 }
 0x1c8   : > { %v2171_v28 = vpop.eup %1799 }
 0x1c9   : > { %v742_v29 = vsel %vm626_vm1, %v2171_v28, 0.0 }
 0x1ca   : > { %743 = vadd.xlane.f32.xlu2 %v742_v29 }
 0x226   : > { %v735_v30 = vpop.xlane.xlu0 %734 }
 0x227   : > { %1801 = vrcp.f32 %v735_v30  ;;  %v756_v36 = vand.u32 2147483648, %v735_v30  ;;  %v754_v38 = vand.u32 2147483647, %v735_v30  ;;  %vm750_vm5 = vweird.f32 %v735_v30 }
 0x229   : > { %v757_v42 = vor.u32 1.1754944e-38, %v756_v36  ;;  %vm755_vm7 = vcmp.eq.f32.partialorder %v754_v38, 8.507059e+37 }
 0x22d   : > { %v1802_v31 = vpop.eup %1801 }
 0x22e   : > { %v746_v32 = vmul.f32 %v1802_v31, %v735_v30  ;;  %v738_v34 = vpop.xlane.xlu1 %737  ;;  %vm751_vm4 = vweird.f32 %v1802_v31 }
 0x22f   : > { %1803 = vrcp.f32 %v738_v34  ;;  %vm752_vm6 = vmor %vm750_vm5, %vm751_vm4  ;;  %v769_v49 = vand.u32 2147483647, %v738_v34  ;;  %v771_v50 = vand.u32 2147483648, %v738_v34  ;;  %vm765_vm9 = vweird.f32 %v738_v34 }
 0x230   : > { %v747_v35 = vsub.f32 1.0, %v746_v32 }
 0x231   : > { %vm770_vm11 = vcmp.eq.f32.partialorder %v769_v49, 8.507059e+37  ;;  %v772_v58 = vor.u32 1.1754944e-38, %v771_v50 }
 0x232   : > { %v748_v37 = vmul.f32 %v1802_v31, %v747_v35 }
 0x234   : > { %v749_v40 = vadd.f32 %v1802_v31, %v748_v37 }
 0x235   : > { %v741_v39 = vpop.xlane.xlu2 %740  ;;  %v1804_v41 = vpop.eup %1803 }
 0x236   : > { %1805 = vrcp.f32 %v741_v39  ;;  %v753_v43 = vsel %vm752_vm6, %v1802_v31, %v749_v40  ;;  %v761_v44 = vmul.f32 %v1804_v41, %v738_v34  ;;  %vm766_vm8 = vweird.f32 %v1804_v41 }
 0x237   : > { %v758_v45 = vsel %vm755_vm7, %v757_v42, %v753_v43  ;;  %vm767_vm10 = vmor %vm765_vm9, %vm766_vm8  ;;  %v786_v59 = vand.u32 2147483648, %v741_v39  ;;  %v784_v62 = vand.u32 2147483647, %v741_v39  ;;  %vm780_vm13 = vweird.f32 %v741_v39 }
 0x238   : > { %v759_v46 = vmul.f32 %v1794_v55, %v758_v45  ;;  %v762_v47 = vsub.f32 1.0, %v761_v44  ;;  %v302_v45 = vld [vmem:[%s2360_s4] sm:$0xf] }
 0x239   : > { %v787_v29 = vor.u32 1.1754944e-38, %v786_v59  ;;  %vm785_vm15 = vcmp.eq.f32.partialorder %v784_v62, 8.507059e+37 }
 0x23a   : > { %v763_v51 = vmul.f32 %v1804_v41, %v762_v47  ;;  %v805_v54 = vpack.c.bf16 %v759_v46, %v759_v46  ;;  %v2185_v46 = vsel %vm816_vm2, %v302_v45, 0 }
 0x23b   : > { %907 = vmatpush.bf16.msrb.mxu0 %v2185_v46 }
 0x23c   : > { %v1806_v48 = vpop.eup %1805  ;;  %v764_v56 = vadd.f32 %v1804_v41, %v763_v51  ;;  %1687 = vmatmul.msk.bf16.vlgmr.msra.gmra.mxu0 %vm626_vm1, %v805_v54 }
 0x23d   : > { %v776_v52 = vmul.f32 %v1806_v48, %v741_v39  ;;  %v744_v53 = vpop.xlane.xlu2 %743  ;;  %vm781_vm12 = vweird.f32 %v1806_v48 }
 0x23e   : > { %1807 = vrcp.f32 %v744_v53  ;;  %v768_v55 = vsel %vm767_vm10, %v1804_v41, %v764_v56  ;;  %vm782_vm14 = vmor %vm780_vm13, %vm781_vm12  ;;  %v801_v37 = vand.u32 2147483648, %v744_v53  ;;  %v799_v40 = vand.u32 2147483647, %v744_v53 }
 0x23f   : > { %v777_v57 = vsub.f32 1.0, %v776_v52  ;;  %v773_v63 = vsel %vm770_vm11, %v772_v58, %v768_v55  ;;  %vm795_vm5 = vweird.f32 %v744_v53  ;;  %994 = vmatpush.bf16.msra.mxu0 %v1977_v0  ;;  %v1695_v52 = vld [vmem:[%s2044_s29 + $0x8] sm:$0xff]  ;;  %s243_s29 = sand.u32 1, %s1879_s22   ;;  %v2259_v58 = vld [vmem:[%s2361_s5] ss:$0 sm:$0xff] }
 0x240   : > { %v774_v12 = vmul.f32 %v1796_v61, %v773_v63  ;;  %v802_v39 = vor.u32 1.1754944e-38, %v801_v37  ;;  %vm800_vm7 = vcmp.eq.f32.partialorder %v799_v40, 8.507059e+37  ;;  %s1572_s12 = sshll.u32 %s243_s29, 4  ;;  %s1491_s28 = scalar_lea.sflag [#allocation3], %s243_s29 }
 0x241   : > { %v778_v60 = vmul.f32 %v1806_v48, %v777_v57  ;;  %s2264_s16 = scalar_lea.vmem [#allocation2], %s1572_s12  ;;  %s1845_s12 = scalar_lea.hbm %s2362_s6, 32 }
 0x242   : > { %v806_v32 = vpack.c.bf16 %v774_v12, %v774_v12  ;;  %s1503_s26 = sshll.u32 %s2264_s16, 4  ;;  %p1847_p1 = scmp.lt.s32.totalorder %s1845_s12, %s1841_s9  ;;  %s1504_s26 = int_to_ptr.vmem [resolvable:$true] %s1503_s26 }
 0x243   : > { %v779_v26 = vadd.f32 %v1806_v48, %v778_v60  ;;  %995 = vmatpush.bf16.msra.mxu0 %v1995_v3  ;;  %v305_v3 = vld [vmem:[%s2360_s4 + $0xc] sm:$0xf] }
 0x244   : > { %v1808_v27 = vpop.eup %1807  ;;  %1688 = vmatmul.msk.bf16.vlgmr.msra.gmra.mxu1 %vm626_vm1, %v806_v32  ;;  %p1848_p2 = por %p1847_p1, %p1846_p0 }
 0x245   : > { %v783_v30 = vsel %vm782_vm14, %v1806_v48, %v779_v26  ;;  %v791_v31 = vmul.f32 %v1808_v27, %v744_v53  ;;  %vm796_vm4 = vweird.f32 %v1808_v27  ;;  %v304_v48 = vld [vmem:[%s2360_s4 + $0x8] sm:$0xf] }
 0x246   : > { %v788_v34 = vsel %vm785_vm15, %v787_v29, %v783_v30  ;;  %vm797_vm6 = vmor %vm795_vm5, %vm796_vm4  ;;  %v2203_v0 = vsel %vm816_vm2, %v304_v48, 0  ;;  %p1849_p3 = pnand %p1848_p2, %p1844_p13 }
 0x247   : > { %v789_v35 = vmul.f32 %v2167_v13, %v788_v34  ;;  %v792_v36 = vsub.f32 1.0, %v791_v31  ;;  %945 = vmatpush.bf16.msrb.mxu2 %v2203_v0 }
 0x249   : > { %v793_v38 = vmul.f32 %v1808_v27, %v792_v36  ;;  %v807_v61 = vpack.c.bf16 %v789_v35, %v789_v35 }
 0x24b   : > { %v794_v41 = vadd.f32 %v1808_v27, %v793_v38  ;;  %1689 = vmatmul.msk.bf16.vlgmr.msra.gmra.mxu2 %vm626_vm1, %v807_v61 }
 0x24c   : > { %1020 = vmatpush.bf16.msra.mxu2 %v1982_v1 }
 0x24d   : > { %v798_v42 = vsel %vm797_vm6, %v1808_v27, %v794_v41 }
 0x24e   : > { %v803_v43 = vsel %vm800_vm7, %v802_v39, %v798_v42 }
 0x24f   : > { %v804_v44 = vmul.f32 %v2171_v28, %v803_v43  ;;  %v303_v28 = vld [vmem:[%s2360_s4 + $0x4] sm:$0xf] }
 0x250   : > { %v2194_v47 = vsel %vm816_vm2, %v303_v28, 0  ;;  %1021 = vmatpush.bf16.msra.mxu2 %v2000_v4  ;;  %v984_v4 = vpack.c.bf16 %v1695_v52, %v1695_v52 }
 0x251   : > { %v808_v13 = vpack.c.bf16 %v804_v44, %v804_v44  ;;  %926 = vmatpush.bf16.msrb.mxu1 %v2194_v47 }
 0x253   : > { %1690 = vmatmul.msk.bf16.vlgmr.msra.gmra.mxu3 %vm626_vm1, %v808_v13 }
 0x255   : > { %1007 = vmatpush.bf16.msra.mxu1 %v2005_v5  ;;  %v2211_v5 = vsel %vm816_vm2, %v305_v3, 0 }
 0x256   : > { %964 = vmatpush.bf16.msrb.mxu3 %v2211_v5 }
 0x259   : > { %1008 = vmatpush.bf16.msra.mxu1 %v2022_v8 }
 0x25a   : > { %1033 = vmatpush.bf16.msra.mxu3 %v1987_v2 }
 0x25e   : > { %1034 = vmatpush.bf16.msra.mxu3 %v2011_v6 }
 0x2b9   : > { %v829_v8 = vpop.f32.mrf.mxu0 }
 0x2ba   : > { %v890_v49 = vpack.c.bf16 %v829_v8, %v829_v8 }
 0x2bc   : > { %1691 = vmatmul.msk.bf16.vlgmr.msrb.gmra.mxu0 %vm626_vm1, %v890_v49 }
 0x2bd   : > { %1046 = vmatpush.bf16.msrb.mxu0 %v2016_v7 }
 0x2c1   : > { %v831_v1 = vpop.f32.mrf.mxu0  ;;  %v848_v50 = vpop.f32.mrf.mxu1  ;;  %1047 = vmatpush.bf16.msrb.mxu0 %v2054_v14 }
 0x2c2   : > { %v891_v51 = vpack.c.bf16 %v848_v50, %v848_v50 }
 0x2c4   : > { %1692 = vmatmul.msk.bf16.vlgmr.msrb.gmra.mxu1 %vm626_vm1, %v891_v51 }
 0x2c5   : > { %1059 = vmatpush.bf16.msrb.mxu1 %v2037_v11 }
 0x2c9   : > { %v850_v2 = vpop.f32.mrf.mxu1  ;;  %1060 = vmatpush.bf16.msrb.mxu1 %v2071_v17 }
 0x2cc   : > { %1696 = vmatmul.msk.bf16.vlgmr.msra.gmra.mxu0 %vm326_vm0, %v984_v4 }
 0x2cd   : > { %1098 = vmatpush.bf16.msra.mxu0 %v2093_v19 }
 0x2ce   : > { %v867_v6 = vpop.f32.mrf.mxu2 }
 0x2cf   : > { %v892_v53 = vpack.c.bf16 %v867_v6, %v867_v6 }
 0x2d1   : > { %1693 = vmatmul.msk.bf16.vlgmr.msrb.gmra.mxu2 %vm626_vm1, %v892_v53  ;;  %1099 = vmatpush.bf16.msra.mxu0 %v2106_v21 }
 0x2d2   : > { %1072 = vmatpush.bf16.msrb.mxu2 %v2027_v9 }
 0x2d4   : > { %1697 = vmatmul.msk.bf16.vlgmr.msra.gmra.mxu1 %vm326_vm0, %v984_v4 }
 0x2d5   : > { %1111 = vmatpush.bf16.msra.mxu1 %v2116_v23 }
 0x2d6   : > { %v869_v7 = vpop.f32.mrf.mxu2  ;;  %v886_v14 = vpop.f32.mrf.mxu3  ;;  %1073 = vmatpush.bf16.msrb.mxu2 %v2059_v15 }
 0x2d7   : > { %v893_v11 = vpack.c.bf16 %v886_v14, %v886_v14 }
 0x2d9   : > { %1694 = vmatmul.msk.bf16.vlgmr.msrb.gmra.mxu3 %vm626_vm1, %v893_v11  ;;  %1112 = vmatpush.bf16.msra.mxu1 %v2132_v25 }
 0x2da   : > { %1085 = vmatpush.bf16.msrb.mxu3 %v2032_v10 }
 0x2dc   : > { %1700 = vmatmul.msk.bf16.vlgmr.msrb.gmra.mxu0 %vm326_vm0, %v984_v4 }
 0x2de   : > { %v888_v17 = vpop.f32.mrf.mxu3  ;;  %1086 = vmatpush.bf16.msrb.mxu3 %v2065_v16 }
 0x2e1   : > { %1698 = vmatmul.msk.bf16.vlgmr.msra.gmra.mxu2 %vm326_vm0, %v984_v4 }
 0x2e2   : > { %1124 = vmatpush.bf16.msra.mxu2 %v2088_v18 }
 0x2e4   : > { %1701 = vmatmul.msk.bf16.vlgmr.msrb.gmra.mxu1 %vm326_vm0, %v984_v4 }
 0x2e6   : > { %1125 = vmatpush.bf16.msra.mxu2 %v2100_v20 }
 0x2e9   : > { %1699 = vmatmul.msk.bf16.vlgmr.msra.gmra.mxu3 %vm326_vm0, %v984_v4 }
 0x2ea   : > { %1137 = vmatpush.bf16.msra.mxu3 %v2111_v22 }
 0x2ec   : > { %1704 = vmatmul.msk.bf16.vlgmr.msra.gmra.mxu0 %vm326_vm0, %v984_v4 }
 0x2ee   : > { %1138 = vmatpush.bf16.msra.mxu3 %v2126_v24 }
 0x2f1   : > { %1702 = vmatmul.msk.bf16.vlgmr.msrb.gmra.mxu2 %vm326_vm0, %v984_v4 }
 0x2f4   : > { %1705 = vmatmul.msk.bf16.vlgmr.msra.gmra.mxu1 %vm326_vm0, %v984_v4 }
 0x2f9   : > { %1703 = vmatmul.msk.bf16.vlgmr.msrb.gmra.mxu3 %vm326_vm0, %v984_v4 }
 0x301   : > { %1706 = vmatmul.msk.bf16.vlgmr.msra.gmra.mxu2 %vm326_vm0, %v984_v4 }
 0x309   : > { %1707 = vmatmul.msk.bf16.vlgmr.msra.gmra.mxu3 %vm326_vm0, %v984_v4 }
 0x339   : > { %v909_v9 = vpop.f32.mrf.mxu0 }
 0x33a   : > { %v970_v23 = vsel %vm326_vm0, %v909_v9, 0.0 }
 0x341   : > { %v911_v10 = vpop.f32.mrf.mxu0  ;;  %v928_v15 = vpop.f32.mrf.mxu1 }
 0x342   : > { %v971_v22 = vsel %vm326_vm0, %v928_v15, 0.0 }
 0x343   : > { %v972_v25 = vadd.f32 %v971_v22, %v970_v23 }
 0x349   : > { %v930_v16 = vpop.f32.mrf.mxu1  ;;  %v997_v18 = vpop.f32.mrf.mxu0 }
 0x34a   : > { %v1144_v27 = vpack.c.bf16 %v997_v18, %v997_v18 }
 0x351   : > { %v999_v20 = vpop.f32.mrf.mxu0  ;;  %v1010_v21 = vpop.f32.mrf.mxu1 }
 0x352   : > { %v1145_v36 = vpack.c.bf16 %v1010_v21, %v1010_v21 }
 0x354   : > { %v947_v19 = vpop.f32.mrf.mxu2 }
 0x355   : > { %v973_v24 = vsel %vm326_vm0, %v947_v19, 0.0 }
 0x356   : > { %v974_v54 = vadd.f32 %v973_v24, %v972_v25 }
 0x359   : > { %v1049_v55 = vpop.f32.mrf.mxu0  ;;  %v1012_v60 = vpop.f32.mrf.mxu1 }
 0x35a   : > { %v1148_v63 = vpack.c.bf16 %v1049_v55, %v1049_v55 }
 0x35c   : > { %v949_v56 = vpop.f32.mrf.mxu2  ;;  %v966_v57 = vpop.f32.mrf.mxu3  ;;  %v1156_v26 = vsel %vm626_vm1, %v1148_v63, 0 }
 0x35d   : > { %v975_v59 = vsel %vm326_vm0, %v966_v57, 0.0  ;;  %1165 = vmatpush.bf16.xpose.msrb.mxu0 %v1156_v26 }
 0x35e   : > { %v976_v62 = vadd.f32 %v975_v59, %v974_v54 }
 0x360   : > { %v980_v12 = vadd.f32 %v2259_v58, %v976_v62 }
 0x361   : > { %v1062_v31 = vpop.f32.mrf.mxu1  ;;  %v1051_v32 = vpop.f32.mrf.mxu0 }
 0x362   : > { %981 = vst.msk [vmem:[%s2264_s16] sm:$0xff] %vm326_vm0, %v980_v12  ;;  %v1149_v34 = vpack.c.bf16 %v1062_v31, %v1062_v31 }
 0x364   : > { %v968_v29 = vpop.f32.mrf.mxu3  ;;  %v1023_v30 = vpop.f32.mrf.mxu2  ;;  %1708 = vmatmul.msk.bf16.vlgmr.msrb.gmra.mxu0 %vm626_vm1, %v1144_v27  ;;  %v1175_v35 = vsel %vm626_vm1, %v1149_v34, 0 }
 0x365   : > { %1184 = vmatpush.bf16.xpose.msrb.mxu1 %v1175_v35  ;;  %v1146_v1 = vpack.c.bf16 %v1023_v30, %v1023_v30 }
 0x369   : > { %v1064_v40 = vpop.f32.mrf.mxu1  ;;  %v1101_v61 = vpop.f32.mrf.mxu0 }
 0x36a   : > { %v1332_v41 = vpack.c.bf16 %v1101_v61, %v1101_v61 }
 0x36c   : > { %v1025_v37 = vpop.f32.mrf.mxu2  ;;  %v1036_v38 = vpop.f32.mrf.mxu3  ;;  %1709 = vmatmul.msk.bf16.vlgmr.msrb.gmra.mxu1 %vm626_vm1, %v1145_v36  ;;  %v1340_v39 = vsel %vm816_vm2, %v1332_v41, 0 }
 0x36d   : > { %1349 = vmatpush.bf16.msra.mxu0 %v1340_v39  ;;  %v1147_v4 = vpack.c.bf16 %v1036_v38, %v1036_v38 }
 0x371   : > { %1426 = vmatpush.bf16.msrb.mxu0 %v2185_v46  ;;  %v1103_v13 = vpop.f32.mrf.mxu0  ;;  %v1114_v45 = vpop.f32.mrf.mxu1 }
 0x372   : > { %v1333_v28 = vpack.c.bf16 %v1114_v45, %v1114_v45 }
 0x374   : > { %v1038_v42 = vpop.f32.mrf.mxu3  ;;  %v1075_v43 = vpop.f32.mrf.mxu2  ;;  %v1359_v3 = vsel %vm816_vm2, %v1333_v28, 0 }
 0x375   : > { %v1150_v44 = vpack.c.bf16 %v1075_v43, %v1075_v43  ;;  %1368 = vmatpush.bf16.msra.mxu1 %v1359_v3 }
 0x377   : > { %v1194_v48 = vsel %vm626_vm1, %v1150_v44, 0 }
 0x378   : > { %1203 = vmatpush.bf16.xpose.msrb.mxu2 %v1194_v48 }
 0x379   : > { %1442 = vmatpush.bf16.msrb.mxu1 %v2194_v47  ;;  %v1116_v51 = vpop.f32.mrf.mxu1 }
 0x37c   : > { %v1077_v8 = vpop.f32.mrf.mxu2  ;;  %v1088_v49 = vpop.f32.mrf.mxu3 }
 0x37d   : > { %v1151_v50 = vpack.c.bf16 %v1088_v49, %v1088_v49 }
 0x37f   : > { %v1213_v46 = vsel %vm626_vm1, %v1151_v50, 0  ;;  %1710 = vmatmul.msk.bf16.vlgmr.msrb.gmra.mxu2 %vm626_vm1, %v1146_v1 }
 0x380   : > { %1222 = vmatpush.bf16.xpose.msrb.mxu3 %v1213_v46 }
 0x384   : > { %v1090_v52 = vpop.f32.mrf.mxu3  ;;  %v1127_v2 = vpop.f32.mrf.mxu2 }
 0x385   : > { %v1334_v6 = vpack.c.bf16 %v1127_v2, %v1127_v2 }
 0x387   : > { %1711 = vmatmul.msk.bf16.vlgmr.msrb.gmra.mxu3 %vm626_vm1, %v1147_v4  ;;  %v1378_v53 = vsel %vm816_vm2, %v1334_v6, 0 }
 0x388   : > { %1387 = vmatpush.bf16.msra.mxu2 %v1378_v53 }
 0x38c   : > { %1458 = vmatpush.bf16.msrb.mxu2 %v2203_v0  ;;  %v1140_v47 = vpop.f32.mrf.mxu3  ;;  %v1129_v14 = vpop.f32.mrf.mxu2 }
 0x38d   : > { %v1335_v7 = vpack.c.bf16 %v1140_v47, %v1140_v47 }
 0x38f   : > { %v1397_v11 = vsel %vm816_vm2, %v1335_v7, 0 }
 0x390   : > { %1406 = vmatpush.bf16.msra.mxu3 %v1397_v11 }
 0x394   : > { %1474 = vmatpush.bf16.msrb.mxu3 %v2211_v5  ;;  %v1142_v17 = vpop.f32.mrf.mxu3 }
 0x3e1   : > { %v1167_v9 = vpop.f32.mrf.mxu0 }
 0x3e2   : > { %v1228_v10 = vsel %vm2149_vm3, %v1167_v9, -1e+30 }
 0x3e3   : > { %v1232_v15 = vsel %vm626_vm1, %v1228_v10, -inf }
 0x3e4   : > { %1233 = vmax.xlane.f32.xlu1 %v1232_v15 }
 0x3e9   : > { %v1186_v16 = vpop.f32.mrf.mxu1  ;;  %v1169_v18 = vpop.f32.mrf.mxu0 }
 0x3ea   : > { %v1229_v5 = vsel %vm2149_vm3, %v1186_v16, -1e+30 }
 0x3eb   : > { %v1235_v54 = vsel %vm626_vm1, %v1229_v5, -inf }
 0x3f1   : > { %v1188_v19 = vpop.f32.mrf.mxu1 }
 0x402   : > { %v1205_v0 = vpop.f32.mrf.mxu2 }
 0x403   : > { %v1230_v20 = vsel %vm2149_vm3, %v1205_v0, -1e+30 }
 0x404   : > { %v1238_v21 = vsel %vm626_vm1, %v1230_v20, -inf }
 0x405   : > { %1239 = vmax.xlane.f32.xlu2 %v1238_v21 }
 0x40a   : > { %v1207_v22 = vpop.f32.mrf.mxu2  ;;  %v1224_v23 = vpop.f32.mrf.mxu3 }
 0x40b   : > { %v1231_v24 = vsel %vm2149_vm3, %v1224_v23, -1e+30 }
 0x40c   : > { %v1241_v25 = vsel %vm626_vm1, %v1231_v24, -inf }
 0x40d   : > { %1242 = vmax.xlane.f32.xlu0 %v1241_v25  ;;  %1236 = vmax.xlane.f32.xlu2 %v1235_v54 }
 0x412   : > { %v1226_v56 = vpop.f32.mrf.mxu3 }
 0x457   : > { %v1234_v57 = vpop.xlane.xlu1 %1233 }
 0x458   : > { %v1244_v59 = vsub.f32 %v1228_v10, %v1234_v57 }
 0x45a   : > { %v1248_v55 = vmul.f32 1.442695, %v1244_v59 }
 0x45c   : > { %1809 = vpow2.f32 %v1248_v55 }
 0x462   : > { %v1810_v60 = vpop.eup %1809 }
 0x463   : > { %v1256_v62 = vsel %vm626_vm1, %v1810_v60, 0.0 }
 0x464   : > { %1257 = vadd.xlane.f32.xlu2 %v1256_v62 }
 0x478   : > { %v1240_v63 = vpop.xlane.xlu2 %1239 }
 0x479   : > { %v1246_v12 = vsub.f32 %v1230_v20, %v1240_v63 }
 0x47b   : > { %v1252_v26 = vmul.f32 1.442695, %v1246_v12 }
 0x47d   : > { %1811 = vpow2.f32 %v1252_v26 }
 0x480   : > { %v1243_v33 = vpop.xlane.xlu0 %1242  ;;  %v1237_v27 = vpop.xlane.xlu2 %1236 }
 0x481   : > { %v1247_v29 = vsub.f32 %v1231_v24, %v1243_v33  ;;  %v1245_v30 = vsub.f32 %v1229_v5, %v1237_v27 }
 0x483   : > { %v1812_v31 = vpop.eup %1811  ;;  %v1254_v32 = vmul.f32 1.442695, %v1247_v29  ;;  %v1250_v34 = vmul.f32 1.442695, %v1245_v30 }
 0x484   : > { %v1262_v35 = vsel %vm626_vm1, %v1812_v31, 0.0 }
 0x485   : > { %1813 = vpow2.f32 %v1254_v32  ;;  %1263 = vadd.xlane.f32.xlu0 %v1262_v35 }
 0x486   : > { %1815 = vpow2.f32 %v1250_v34 }
 0x48b   : > { %v2297_v36 = vpop.eup %1813 }
 0x48c   : > { %v2299_v37 = vpop.eup %1815  ;;  %v1265_v38 = vsel %vm626_vm1, %v2297_v36, 0.0 }
 0x48d   : > { %v1259_v40 = vsel %vm626_vm1, %v2299_v37, 0.0  ;;  %1266 = vadd.xlane.f32.xlu1 %v1265_v38 }
 0x48e   : > { %1260 = vadd.xlane.f32.xlu0 %v1259_v40 }
 0x4d7   : > { %v1258_v61 = vpop.xlane.xlu2 %1257 }
 0x4d8   : > { %1817 = vrcp.f32 %v1258_v61  ;;  %v1279_v43 = vand.u32 2147483648, %v1258_v61  ;;  %v1277_v13 = vand.u32 2147483647, %v1258_v61  ;;  %vm1273_vm3 = vweird.f32 %v1258_v61 }
 0x4da   : > { %v1280_v28 = vor.u32 1.1754944e-38, %v1279_v43  ;;  %vm1278_vm9 = vcmp.eq.f32.partialorder %v1277_v13, 8.507059e+37 }
 0x4de   : > { %v1818_v41 = vpop.eup %1817 }
 0x4df   : > { %v1269_v39 = vmul.f32 %v1818_v41, %v1258_v61  ;;  %vm1274_vm2 = vweird.f32 %v1818_v41 }
 0x4e0   : > { %vm1275_vm8 = vmor %vm1273_vm3, %vm1274_vm2 }
 0x4e1   : > { %v1270_v42 = vsub.f32 1.0, %v1269_v39 }
 0x4e3   : > { %v1271_v44 = vmul.f32 %v1818_v41, %v1270_v42 }
 0x4e5   : > { %v1272_v45 = vadd.f32 %v1818_v41, %v1271_v44 }
 0x4e7   : > { %v1276_v48 = vsel %vm1275_vm8, %v1818_v41, %v1272_v45 }
 0x4e8   : > { %v1281_v3 = vsel %vm1278_vm9, %v1280_v28, %v1276_v48 }
 0x4e9   : > { %v1282_v8 = vmul.f32 %v1810_v60, %v1281_v3 }
 0x4eb   : > { %v1328_v49 = vpack.c.bf16 %v1282_v8, %v1282_v8 }
 0x4ed   : > { %1712 = vmatmul.msk.bf16.vlgmr.msra.gmra.mxu0 %vm626_vm1, %v1328_v49 }
 0x4f8   : > { %v1264_v1 = vpop.xlane.xlu0 %1263 }
 0x4f9   : > { %1819 = vrcp.f32 %v1264_v1  ;;  %v1309_v2 = vand.u32 2147483648, %v1264_v1  ;;  %v1307_v53 = vand.u32 2147483647, %v1264_v1  ;;  %vm1303_vm11 = vweird.f32 %v1264_v1 }
 0x4fb   : > { %v1310_v14 = vor.u32 1.1754944e-38, %v1309_v2  ;;  %vm1308_vm13 = vcmp.eq.f32.partialorder %v1307_v53, 8.507059e+37 }
 0x4ff   : > { %v1820_v50 = vpop.eup %1819 }
 0x500   : > { %v1299_v51 = vmul.f32 %v1820_v50, %v1264_v1  ;;  %v1267_v46 = vpop.xlane.xlu1 %1266  ;;  %vm1304_vm10 = vweird.f32 %v1820_v50 }
 0x501   : > { %v1261_v52 = vpop.xlane.xlu0 %1260  ;;  %1821 = vrcp.f32 %v1267_v46  ;;  %vm1305_vm12 = vmor %vm1303_vm11, %vm1304_vm10  ;;  %v1322_v0 = vand.u32 2147483647, %v1267_v46  ;;  %v1324_v20 = vand.u32 2147483648, %v1267_v46  ;;  %vm1318_vm4 = vweird.f32 %v1267_v46 }
 0x502   : > { %v1300_v4 = vsub.f32 1.0, %v1299_v51  ;;  %1823 = vrcp.f32 %v1261_v52  ;;  %v1294_v21 = vand.u32 2147483648, %v1261_v52  ;;  %v1292_v24 = vand.u32 2147483647, %v1261_v52 }
 0x503   : > { %vm1288_vm5 = vweird.f32 %v1261_v52  ;;  %v1325_v56 = vor.u32 1.1754944e-38, %v1324_v20  ;;  %vm1323_vm2 = vcmp.eq.f32.partialorder %v1322_v0, 8.507059e+37 }
 0x504   : > { %v1301_v6 = vmul.f32 %v1820_v50, %v1300_v4  ;;  %v1295_v57 = vor.u32 1.1754944e-38, %v1294_v21  ;;  %vm1293_vm3 = vcmp.eq.f32.partialorder %v1292_v24, 8.507059e+37 }
 0x506   : > { %v1302_v47 = vadd.f32 %v1820_v50, %v1301_v6 }
 0x507   : > { %v1822_v7 = vpop.eup %1821 }
 0x508   : > { %v1824_v11 = vpop.eup %1823  ;;  %v1306_v17 = vsel %vm1305_vm12, %v1820_v50, %v1302_v47  ;;  %v1314_v9 = vmul.f32 %v1822_v7, %v1267_v46  ;;  %vm1319_vm14 = vweird.f32 %v1822_v7 }
 0x509   : > { %v1311_v10 = vsel %vm1308_vm13, %v1310_v14, %v1306_v17  ;;  %v1284_v15 = vmul.f32 %v1824_v11, %v1261_v52  ;;  %vm1289_vm15 = vweird.f32 %v1824_v11  ;;  %vm1320_vm6 = vmor %vm1318_vm4, %vm1319_vm14 }
 0x50a   : > { %v1312_v16 = vmul.f32 %v1812_v31, %v1311_v10  ;;  %v1315_v18 = vsub.f32 1.0, %v1314_v9  ;;  %vm1290_vm7 = vmor %vm1288_vm5, %vm1289_vm15 }
 0x50b   : > { %v1285_v19 = vsub.f32 1.0, %v1284_v15 }
 0x50c   : > { %v1316_v5 = vmul.f32 %v1822_v7, %v1315_v18  ;;  %v1330_v22 = vpack.c.bf16 %v1312_v16, %v1312_v16 }
 0x50d   : > { %v1286_v23 = vmul.f32 %v1824_v11, %v1285_v19 }
 0x50e   : > { %v1317_v25 = vadd.f32 %v1822_v7, %v1316_v5  ;;  %1714 = vmatmul.msk.bf16.vlgmr.msra.gmra.mxu2 %vm626_vm1, %v1330_v22 }
 0x50f   : > { %v1287_v54 = vadd.f32 %v1824_v11, %v1286_v23 }
 0x510   : > { %v1321_v59 = vsel %vm1320_vm6, %v1822_v7, %v1317_v25 }
 0x511   : > { %v1291_v55 = vsel %vm1290_vm7, %v1824_v11, %v1287_v54  ;;  %v1326_v60 = vsel %vm1323_vm2, %v1325_v56, %v1321_v59 }
 0x512   : > { %v1296_v62 = vsel %vm1293_vm3, %v1295_v57, %v1291_v55  ;;  %v1327_v63 = vmul.f32 %v2297_v36, %v1326_v60 }
 0x513   : > { %v1297_v12 = vmul.f32 %v2299_v37, %v1296_v62 }
 0x514   : > { %v1331_v26 = vpack.c.bf16 %v1327_v63, %v1327_v63 }
 0x515   : > { %v1329_v33 = vpack.c.bf16 %v1297_v12, %v1297_v12 }
 0x516   : > { %1715 = vmatmul.msk.bf16.vlgmr.msra.gmra.mxu3 %vm626_vm1, %v1331_v26 }
 0x517   : > { %1713 = vmatmul.msk.bf16.vlgmr.msra.gmra.mxu1 %vm626_vm1, %v1329_v33 }
 0x56a   : > { %v1351_v27 = vpop.f32.mrf.mxu0 }
 0x56b   : > { %v1412_v29 = vpack.c.bf16 %v1351_v27, %v1351_v27 }
 0x56d   : > { %1716 = vmatmul.msk.bf16.vlgmr.msrb.gmra.mxu0 %vm626_vm1, %v1412_v29 }
 0x572   : > { %v1353_v30 = vpop.f32.mrf.mxu0 }
 0x591   : > { %v1389_v31 = vpop.f32.mrf.mxu2 }
 0x592   : > { %v1414_v32 = vpack.c.bf16 %v1389_v31, %v1389_v31 }
 0x594   : > { %v1370_v34 = vpop.f32.mrf.mxu1  ;;  %1718 = vmatmul.msk.bf16.vlgmr.msrb.gmra.mxu2 %vm626_vm1, %v1414_v32 }
 0x595   : > { %v1413_v35 = vpack.c.bf16 %v1370_v34, %v1370_v34 }
 0x597   : > { %1717 = vmatmul.msk.bf16.vlgmr.msrb.gmra.mxu1 %vm626_vm1, %v1413_v35 }
 0x599   : > { %v1391_v36 = vpop.f32.mrf.mxu2  ;;  %v1408_v37 = vpop.f32.mrf.mxu3 }
 0x59a   : > { %v1415_v38 = vpack.c.bf16 %v1408_v37, %v1408_v37 }
 0x59c   : > { %v1372_v40 = vpop.f32.mrf.mxu1  ;;  %1719 = vmatmul.msk.bf16.vlgmr.msrb.gmra.mxu3 %vm626_vm1, %v1415_v38 }
 0x5a1   : > { %v1410_v61 = vpop.f32.mrf.mxu3 }
 0x5ea   : > { %v1428_v41 = vpop.f32.mrf.mxu0 }
 0x5eb   : > { %v1480_v13 = vsel %vm326_vm0, %v1428_v41, 0.0 }
 0x5f2   : > { %v1430_v39 = vpop.f32.mrf.mxu0 }
 0x614   : > { %v1444_v42 = vpop.f32.mrf.mxu1 }
 0x615   : > { %v1481_v44 = vsel %vm326_vm0, %v1444_v42, 0.0 }
 0x616   : > { %v1482_v48 = vadd.f32 %v1481_v44, %v1480_v13 }
 0x617   : > { %v1460_v43 = vpop.f32.mrf.mxu2 }
 0x618   : > { %v1483_v45 = vsel %vm326_vm0, %v1460_v43, 0.0 }
 0x619   : > { %v1484_v3 = vadd.f32 %v1483_v45, %v1482_v48 }
 0x61c   : > { %v1446_v28 = vpop.f32.mrf.mxu1 }
 0x61f   : > { %v1462_v8 = vpop.f32.mrf.mxu2  ;;  %v1476_v49 = vpop.f32.mrf.mxu3 }
 0x620   : > { %v1485_v1 = vsel %vm326_vm0, %v1476_v49, 0.0 }
 0x621   : > { %v1486_v50 = vadd.f32 %v1485_v1, %v1484_v3 }
 0x623   : > { %v1487_v51 = vadd.f32 %v2259_v58, %v1486_v50 }
 0x625   : > { %1720 = vst.msk [vmem:[%s2264_s16 + $0x8] sm:$0xff] %vm326_vm0, %v1487_v51 }
 0x626   : > { %1852 = shalt.err (!%p1849_p3)
}
 0x627   : > { %s1889_s29 = smov 128   ;;  %s1890_s16 = smov 8   ;;  %v1478_v58 = vpop.f32.mrf.mxu3 }
 0x628   : > { %1751 = dma.vmem_to_hbm [thread:$0]  (%p1964_p5), %s1504_s26, 256, %s1506_s25, %s1491_s28, %s1889_s29, %s1889_s29, %s1890_s16  }
 0x629 PF: > { %p1757_p4 = scmp.ge.s32.totalorder %s1887_s24, 2  ;;  %s1520_s17 = sand.u32 1, %s1875_s21  }
 0x62a   : > { %s1521_s18 = scalar_lea.sflag [#allocation3], %s1520_s17 }
 0x62b   : > { %p1754_p7 = pnand %p1757_p4, %p1968_p6 }
 0x62d   : > { %p1755_p8 = pneg %p1754_p7 }
 0x62f   : > { %1870 = dma.done.wait (%p1755_p8), %s1521_s18, 256  }
 0x630   : > { %1872 = vsyncadd (%p1755_p8), %s1521_s18, 4294967040  ;;  %p16_p9 = scmp.ge.s32.totalorder %s1951_s27, 4   ;;  %s2367_s21 = smov %s1879_s22 }
 0x631   : > { %s2368_s22 = smov %s1883_s23  ;;  %s2369_s23 = smov %s1962_s30 }
 0x632   : > { %s2370_s24 = smov %s1951_s27  ;;  %18 = sbr.rel (!%p16_p9) target bundleno = 3 (0x3), region = 81 }
 0x637   :  { %1527 = vsyncpa [#allocation3], 1 }
 0x638   :  { %1529 = vsyncpa [#allocation3 + $0x1], 1 }

</bundles_post_ra>
